<compile_context>
chip_gen: v7x
topology: tpu7x:2x2x1
jax: 0.10.0
libtpu: 0.0.40
codegen_flags: <defaults>
</compile_context>

<pallas_src>
from functools import partial

import jax
import jax.numpy as jnp
from jax.experimental import pallas as pl
from jax.experimental.pallas import tpu as pltpu

F_IN = 30      # GCNConv(30, 40) input features
HID = 40       # hidden width of the three GCNConv layers
LANE = 128     # TPU lane width; lane axes are padded to this


def gcn_regr_kernel(a_ref, p_ref, x_ref, w_ref, b_ref, out_ref):
    """One tile = `batches_per_tile` graph-batches packed along the node axis.

    a_ref : [M, M]        block-diag D^-1/2 (A+I) D^-1/2 for the packed batches
    p_ref : [GP, M]       block-diag mean-pool matrix (GP = BT * num_graphs)
    x_ref : [M, 128]      node features, lane-padded (cols >= 30 are zero)
    w_ref : [4, 128, 128] lane-padded W1, W2, W3, W_lin
    b_ref : [8, 128]      sublane-aligned biases (rows 0..3 = b1, b2, b3, b_lin)
    out_ref:[GP, 128]     lane-dense output; column 0 holds the regression value
    """
    a = a_ref[...]
    x = x_ref[...]

    # conv1: GCNConv(30, 40) -> A @ (X @ W1) + b1, then ReLU. (dropout = id.)
    h = jnp.dot(x, w_ref[0], preferred_element_type=jnp.float32)
    h = jnp.dot(a, h, preferred_element_type=jnp.float32) + b_ref[0:1, :]
    h = jnp.maximum(h, 0.0)

    # conv2: GCNConv(40, 40)
    h = jnp.dot(h, w_ref[1], preferred_element_type=jnp.float32)
    h = jnp.dot(a, h, preferred_element_type=jnp.float32) + b_ref[1:2, :]
    h = jnp.maximum(h, 0.0)

    # conv3: GCNConv(40, 40)
    h = jnp.dot(h, w_ref[2], preferred_element_type=jnp.float32)
    h = jnp.dot(a, h, preferred_element_type=jnp.float32) + b_ref[2:3, :]
    h = jnp.maximum(h, 0.0)

    # global_mean_pool via the block-diagonal pooling matrix. (dropout = id.)
    pooled = jnp.dot(p_ref[...], h, preferred_element_type=jnp.float32)

    # lin: Linear(40, 1), lane-padded so the store stays 128-lane dense; only
    # column 0 of the output is meaningful (the rest is exactly zero + bias pad).
    out_ref[...] = (jnp.dot(pooled, w_ref[3],
                            preferred_element_type=jnp.float32)
                    + b_ref[3:4, :])


def pack_params(w1, b1, w2, b2, w3, b3, wl, bl):
    """Pack the 8 tiny parameter tensors into two lane-padded VMEM slabs."""
    w_all = jnp.zeros((4, LANE, LANE), jnp.float32)
    w_all = w_all.at[0, :F_IN, :HID].set(w1)
    w_all = w_all.at[1, :HID, :HID].set(w2)
    w_all = w_all.at[2, :HID, :HID].set(w3)
    w_all = w_all.at[3, :HID, :1].set(wl)
    b_all = jnp.zeros((8, LANE), jnp.float32)
    b_all = b_all.at[0, :HID].set(b1)
    b_all = b_all.at[1, :HID].set(b2)
    b_all = b_all.at[2, :HID].set(b3)
    b_all = b_all.at[3, :1].set(bl)
    return w_all, b_all


@partial(jax.jit, static_argnames=("batches_per_tile",))
def gcn_regr_forward(a_norm, pool_mat, x,
                     w1, b1, w2, b2, w3, b3, wl, bl,
                     batches_per_tile=8):
    """Batched GCN_REGR inference.

    a_norm  : [B, N, N]    per-batch normalized adjacency
    pool_mat: [B, G, N]    per-batch mean-pool matrix
    x       : [B, N, F_IN] per-batch node features
    Returns : [B, G, 1]
    """
    B, N, _ = a_norm.shape
    G = pool_mat.shape[1]
    BT = batches_per_tile          # 8 -> 128-row matmuls; 16 -> 256-row pass
    B_pad = -(-B // BT) * BT
    pad = B_pad - B
    if pad:
        a_norm = jnp.pad(a_norm, ((0, pad), (0, 0), (0, 0)))
        pool_mat = jnp.pad(pool_mat, ((0, pad), (0, 0), (0, 0)))
        x = jnp.pad(x, ((0, pad), (0, 0), (0, 0)))
    T = B_pad // BT
    M = BT * N
    GP = BT * G

    # Block-diagonal packing of BT graph-batches per tile (plain-JAX glue,
    # fused under jit).
    eye = jnp.eye(BT, dtype=jnp.float32)
    a_bd = jnp.einsum('tbij,bc->tbicj',
                      a_norm.reshape(T, BT, N, N), eye).reshape(T, M, M)
    p_bd = jnp.einsum('tbgj,bc->tbgcj',
                      pool_mat.reshape(T, BT, G, N), eye).reshape(T, GP, M)
    x_cat = jnp.pad(x, ((0, 0), (0, 0), (0, LANE - x.shape[-1])))
    x_cat = x_cat.reshape(T, M, LANE)

    w_all, b_all = pack_params(w1, b1, w2, b2, w3, b3, wl, bl)

    out = pl.pallas_call(
        gcn_regr_kernel,
        out_shape=jax.ShapeDtypeStruct((T, GP, LANE), jnp.float32),
        grid=(T,),
        in_specs=[
            pl.BlockSpec((None, M, M), lambda t: (t, 0, 0)),
            pl.BlockSpec((None, GP, M), lambda t: (t, 0, 0)),
            pl.BlockSpec((None, M, LANE), lambda t: (t, 0, 0)),
            # Parameter slabs: constant index_map -> fetched once for the grid.
            pl.BlockSpec((4, LANE, LANE), lambda t: (0, 0, 0)),
            pl.BlockSpec((8, LANE), lambda t: (0, 0)),
        ],
        out_specs=pl.BlockSpec((None, GP, LANE), lambda t: (t, 0, 0)),
        compiler_params=pltpu.CompilerParams(
            dimension_semantics=("parallel",)),
    )(a_bd, p_bd, x_cat, w_all, b_all)

    return out.reshape(B_pad, G, LANE)[:B, :, :1]


def build_normalized_adjacency(edge_index, num_nodes):
    """Dense D^-1/2 (A + I) D^-1/2 like PyG's gcn_norm (add_self_loops=True).

    Assumes edge_index has no pre-existing self-loops or duplicate edges
    (duplicates would be double counted relative to PyG's gcn_norm).
    """
    src, dst = edge_index
    adj = jnp.zeros((num_nodes, num_nodes), jnp.float32)
    adj = adj.at[dst, src].add(1.0)                     # aggregate src -> dst
    adj = adj + jnp.eye(num_nodes, dtype=jnp.float32)   # self loops
    deg = adj.sum(axis=1)
    dinv = jnp.where(deg > 0, 1.0 / jnp.sqrt(deg), 0.0)
    return dinv[:, None] * adj * dinv[None, :]


def build_pool_matrix(batch, num_graphs):
    """[G, N] matrix whose rows compute the per-graph mean of node features."""
    onehot = (batch[None, :] == jnp.arange(num_graphs)[:, None]).astype(jnp.float32)
    counts = onehot.sum(axis=1, keepdims=True)
    return onehot / jnp.maximum(counts, 1.0)


def glorot(key, shape):
    fan_in, fan_out = shape
    limit = jnp.sqrt(6.0 / (fan_in + fan_out))
    return jax.random.uniform(key, shape, jnp.float32, -limit, limit)


if __name__ == "__main__":
    key = jax.random.PRNGKey(0)
    k_x, k1, k2, k3, k4, k5 = jax.random.split(key, 6)

    # 16 graph-batches; each has 16 nodes split into 2 graphs of 8 nodes.
    B, N, G = 16, 16, 2
    npg = N // G
    x = jax.random.normal(k_x, (B, N, F_IN), jnp.float32)

    # Deterministic undirected edges per batch: ring within each graph plus a
    # batch-varying chord (chord offsets avoid duplicating ring edges).
    a_list = []
    for b in range(B):
        src, dst = [], []
        for g in range(G):
            base = g * npg
            for i in range(npg):
                u, v = base + i, base + (i + 1) % npg
                src += [u, v]; dst += [v, u]
            off = 2 + ((b + g) % (npg - 3))
            u, v = base, base + off
            src += [u, v]; dst += [v, u]
        edge_index = jnp.array([src, dst], dtype=jnp.int32)
        a_list.append(build_normalized_adjacency(edge_index, N))
    a_norm = jnp.stack(a_list)                                   # [B, N, N]

    batch_vec = jnp.repeat(jnp.arange(G, dtype=jnp.int32), npg)
    pool_mat = jnp.tile(build_pool_matrix(batch_vec, G)[None], (B, 1, 1))

    # Parameters: GCNConv glorot weight [in, out] + zero bias; Linear uniform.
    w1 = glorot(k1, (F_IN, HID)); b1 = jnp.zeros((HID,), jnp.float32)
    w2 = glorot(k2, (HID, HID));  b2 = jnp.zeros((HID,), jnp.float32)
    w3 = glorot(k3, (HID, HID));  b3 = jnp.zeros((HID,), jnp.float32)
    wl = glorot(k4, (HID, 1))
    bl = jax.random.uniform(k5, (1,), jnp.float32, -0.1, 0.1)

    out = gcn_regr_forward(a_norm, pool_mat, x,
                           w1, b1, w2, b2, w3, b3, wl, bl,
                           batches_per_tile=8)
    jax.block_until_ready(out)
    assert out.shape == (B, G, 1)

    # Pure-JAX reference (per graph-batch), vmapped over the batch axis.
    def ref_single(a, p, xb):
        h = jnp.maximum(a @ (xb @ w1) + b1, 0.0)
        h = jnp.maximum(a @ (h @ w2) + b2, 0.0)
        h = jnp.maximum(a @ (h @ w3) + b3, 0.0)
        return (p @ h) @ wl + bl

    ref = jax.vmap(ref_single)(a_norm, pool_mat, x)
    assert jnp.allclose(out, ref, atol=5e-4, rtol=5e-4), (
        float(jnp.max(jnp.abs(out - ref))))
    print("KERNEL_OK")
</pallas_src>

<mosaic_0001>
module attributes {stable_mosaic.version = 11 : i64} {
  func.func @gcn_regr_kernel(%arg0: i32, %arg1: memref<1x128x128xf32, #tpu.memory_space<vmem>>, %arg2: memref<1x16x128xf32, #tpu.memory_space<vmem>>, %arg3: memref<1x128x128xf32, #tpu.memory_space<vmem>>, %arg4: memref<4x128x128xf32, #tpu.memory_space<vmem>>, %arg5: memref<8x128xf32, #tpu.memory_space<vmem>>, %arg6: memref<1x16x128xf32, #tpu.memory_space<vmem>>) attributes {dimension_semantics = [#tpu.dimension_semantics<parallel>], iteration_bounds = array<i64: 2>, scalar_prefetch = 0 : i64, scratch_operands = 0 : i64, tpu.core_type = #tpu.core_type<tc>, window_params = [{transform_indices = @transform_0, window_bounds = array<i64: 1, 128, 128>}, {transform_indices = @transform_1, window_bounds = array<i64: 1, 16, 128>}, {transform_indices = @transform_2, window_bounds = array<i64: 1, 128, 128>}, {pipeline_mode = #tpu.pipeline_mode<synchronous>, transform_indices = @transform_3, window_bounds = array<i64: 4, 128, 128>}, {pipeline_mode = #tpu.pipeline_mode<synchronous>, transform_indices = @transform_4, window_bounds = array<i64: 8, 128>}, {transform_indices = @transform_5, window_bounds = array<i64: 1, 16, 128>}]} {
    %c0 = arith.constant 0 : index
    %c0_0 = arith.constant 0 : index
    %c0_1 = arith.constant 0 : index
    %0 = vector.load %arg1[%c0, %c0_0, %c0_1] : memref<1x128x128xf32, #tpu.memory_space<vmem>>, vector<1x128x128xf32>
    %1 = vector.shape_cast %0 : vector<1x128x128xf32> to vector<128x128xf32>
    %c0_2 = arith.constant 0 : index
    %c0_3 = arith.constant 0 : index
    %c0_4 = arith.constant 0 : index
    %2 = vector.load %arg3[%c0_2, %c0_3, %c0_4] : memref<1x128x128xf32, #tpu.memory_space<vmem>>, vector<1x128x128xf32>
    %3 = vector.shape_cast %2 : vector<1x128x128xf32> to vector<128x128xf32>
    %c0_5 = arith.constant 0 : index
    %c0_6 = arith.constant 0 : index
    %c0_7 = arith.constant 0 : index
    %4 = vector.load %arg4[%c0_5, %c0_6, %c0_7] : memref<4x128x128xf32, #tpu.memory_space<vmem>>, vector<1x128x128xf32>
    %5 = vector.shape_cast %4 : vector<1x128x128xf32> to vector<128x128xf32>
    %cst = arith.constant dense<0.000000e+00> : vector<128x128xf32>
    %6 = tpu.matmul %3, %5, %cst {dimension_numbers = #tpu.dot_dimension_numbers<[1], [0], [0], [1], [0, 0, 1, 1], [], []>} : vector<128x128xf32>, vector<128x128xf32>, vector<128x128xf32> -> vector<128x128xf32>
    %cst_8 = arith.constant dense<0.000000e+00> : vector<128x128xf32>
    %7 = tpu.matmul %1, %6, %cst_8 {dimension_numbers = #tpu.dot_dimension_numbers<[1], [0], [0], [1], [0, 0, 1, 1], [], []>} : vector<128x128xf32>, vector<128x128xf32>, vector<128x128xf32> -> vector<128x128xf32>
    %c0_9 = arith.constant 0 : index
    %c0_10 = arith.constant 0 : index
    %8 = vector.load %arg5[%c0_9, %c0_10] : memref<8x128xf32, #tpu.memory_space<vmem>>, vector<1x128xf32>
    %9 = vector.broadcast %8 : vector<1x128xf32> to vector<128x128xf32>
    %10 = arith.addf %7, %9 : vector<128x128xf32>
    %cst_11 = arith.constant 0.000000e+00 : f32
    %11 = vector.broadcast %cst_11 : f32 to vector<128x128xf32>
    %12 = arith.maximumf %10, %11 : vector<128x128xf32>
    %c1 = arith.constant 1 : index
    %c0_12 = arith.constant 0 : index
    %c0_13 = arith.constant 0 : index
    %13 = vector.load %arg4[%c1, %c0_12, %c0_13] : memref<4x128x128xf32, #tpu.memory_space<vmem>>, vector<1x128x128xf32>
    %14 = vector.shape_cast %13 : vector<1x128x128xf32> to vector<128x128xf32>
    %cst_14 = arith.constant dense<0.000000e+00> : vector<128x128xf32>
    %15 = tpu.matmul %12, %14, %cst_14 {dimension_numbers = #tpu.dot_dimension_numbers<[1], [0], [0], [1], [0, 0, 1, 1], [], []>} : vector<128x128xf32>, vector<128x128xf32>, vector<128x128xf32> -> vector<128x128xf32>
    %cst_15 = arith.constant dense<0.000000e+00> : vector<128x128xf32>
    %16 = tpu.matmul %1, %15, %cst_15 {dimension_numbers = #tpu.dot_dimension_numbers<[1], [0], [0], [1], [0, 0, 1, 1], [], []>} : vector<128x128xf32>, vector<128x128xf32>, vector<128x128xf32> -> vector<128x128xf32>
    %c1_16 = arith.constant 1 : index
    %c0_17 = arith.constant 0 : index
    %17 = vector.load %arg5[%c1_16, %c0_17] : memref<8x128xf32, #tpu.memory_space<vmem>>, vector<1x128xf32>
    %18 = vector.broadcast %17 : vector<1x128xf32> to vector<128x128xf32>
    %19 = arith.addf %16, %18 : vector<128x128xf32>
    %cst_18 = arith.constant 0.000000e+00 : f32
    %20 = vector.broadcast %cst_18 : f32 to vector<128x128xf32>
    %21 = arith.maximumf %19, %20 : vector<128x128xf32>
    %c2 = arith.constant 2 : index
    %c0_19 = arith.constant 0 : index
    %c0_20 = arith.constant 0 : index
    %22 = vector.load %arg4[%c2, %c0_19, %c0_20] : memref<4x128x128xf32, #tpu.memory_space<vmem>>, vector<1x128x128xf32>
    %23 = vector.shape_cast %22 : vector<1x128x128xf32> to vector<128x128xf32>
    %cst_21 = arith.constant dense<0.000000e+00> : vector<128x128xf32>
    %24 = tpu.matmul %21, %23, %cst_21 {dimension_numbers = #tpu.dot_dimension_numbers<[1], [0], [0], [1], [0, 0, 1, 1], [], []>} : vector<128x128xf32>, vector<128x128xf32>, vector<128x128xf32> -> vector<128x128xf32>
    %cst_22 = arith.constant dense<0.000000e+00> : vector<128x128xf32>
    %25 = tpu.matmul %1, %24, %cst_22 {dimension_numbers = #tpu.dot_dimension_numbers<[1], [0], [0], [1], [0, 0, 1, 1], [], []>} : vector<128x128xf32>, vector<128x128xf32>, vector<128x128xf32> -> vector<128x128xf32>
    %c2_23 = arith.constant 2 : index
    %c0_24 = arith.constant 0 : index
    %26 = vector.load %arg5[%c2_23, %c0_24] : memref<8x128xf32, #tpu.memory_space<vmem>>, vector<1x128xf32>
    %27 = vector.broadcast %26 : vector<1x128xf32> to vector<128x128xf32>
    %28 = arith.addf %25, %27 : vector<128x128xf32>
    %cst_25 = arith.constant 0.000000e+00 : f32
    %29 = vector.broadcast %cst_25 : f32 to vector<128x128xf32>
    %30 = arith.maximumf %28, %29 : vector<128x128xf32>
    %c0_26 = arith.constant 0 : index
    %c0_27 = arith.constant 0 : index
    %c0_28 = arith.constant 0 : index
    %31 = vector.load %arg2[%c0_26, %c0_27, %c0_28] : memref<1x16x128xf32, #tpu.memory_space<vmem>>, vector<1x16x128xf32>
    %32 = vector.shape_cast %31 : vector<1x16x128xf32> to vector<16x128xf32>
    %cst_29 = arith.constant dense<0.000000e+00> : vector<16x128xf32>
    %33 = tpu.matmul %32, %30, %cst_29 {dimension_numbers = #tpu.dot_dimension_numbers<[1], [0], [0], [1], [0, 0, 1, 1], [], []>} : vector<16x128xf32>, vector<128x128xf32>, vector<16x128xf32> -> vector<16x128xf32>
    %c3 = arith.constant 3 : index
    %c0_30 = arith.constant 0 : index
    %c0_31 = arith.constant 0 : index
    %34 = vector.load %arg4[%c3, %c0_30, %c0_31] : memref<4x128x128xf32, #tpu.memory_space<vmem>>, vector<1x128x128xf32>
    %35 = vector.shape_cast %34 : vector<1x128x128xf32> to vector<128x128xf32>
    %cst_32 = arith.constant dense<0.000000e+00> : vector<16x128xf32>
    %36 = tpu.matmul %33, %35, %cst_32 {dimension_numbers = #tpu.dot_dimension_numbers<[1], [0], [0], [1], [0, 0, 1, 1], [], []>} : vector<16x128xf32>, vector<128x128xf32>, vector<16x128xf32> -> vector<16x128xf32>
    %c3_33 = arith.constant 3 : index
    %c0_34 = arith.constant 0 : index
    %37 = vector.load %arg5[%c3_33, %c0_34] : memref<8x128xf32, #tpu.memory_space<vmem>>, vector<1x128xf32>
    %38 = vector.broadcast %37 : vector<1x128xf32> to vector<16x128xf32>
    %39 = arith.addf %36, %38 : vector<16x128xf32>
    %c0_35 = arith.constant 0 : index
    %c0_36 = arith.constant 0 : index
    %c0_37 = arith.constant 0 : index
    %40 = vector.load %arg6[%c0_35, %c0_36, %c0_37] : memref<1x16x128xf32, #tpu.memory_space<vmem>>, vector<1x16x128xf32>
    %41 = vector.shape_cast %40 : vector<1x16x128xf32> to vector<16x128xf32>
    %42 = vector.shape_cast %39 : vector<16x128xf32> to vector<1x16x128xf32>
    tpu.vector_store %arg6[%c0_35, %c0_36, %c0_37], %42 {strides = array<i32>} : memref<1x16x128xf32, #tpu.memory_space<vmem>>, vector<1x16x128xf32>,
    return
  }
  func.func @transform_0(%arg0: i32) -> (i32, i32, i32) {
    %c0_i32 = arith.constant 0 : i32
    %c0_i32_0 = arith.constant 0 : i32
    %c0_i32_1 = arith.constant 0 : i32
    return %arg0, %c0_i32, %c0_i32_0 : i32, i32, i32
  }
  func.func @transform_1(%arg0: i32) -> (i32, i32, i32) {
    %c0_i32 = arith.constant 0 : i32
    %c0_i32_0 = arith.constant 0 : i32
    %c0_i32_1 = arith.constant 0 : i32
    return %arg0, %c0_i32, %c0_i32_0 : i32, i32, i32
  }
  func.func @transform_2(%arg0: i32) -> (i32, i32, i32) {
    %c0_i32 = arith.constant 0 : i32
    %c0_i32_0 = arith.constant 0 : i32
    %c0_i32_1 = arith.constant 0 : i32
    return %arg0, %c0_i32, %c0_i32_0 : i32, i32, i32
  }
  func.func @transform_3(%arg0: i32) -> (i32, i32, i32) {
    %c0_i32 = arith.constant 0 : i32
    %c0_i32_0 = arith.constant 0 : i32
    %c0_i32_1 = arith.constant 0 : i32
    %c0_i32_2 = arith.constant 0 : i32
    return %c0_i32, %c0_i32_0, %c0_i32_1 : i32, i32, i32
  }
  func.func @transform_4(%arg0: i32) -> (i32, i32) {
    %c0_i32 = arith.constant 0 : i32
    %c0_i32_0 = arith.constant 0 : i32
    %c0_i32_1 = arith.constant 0 : i32
    return %c0_i32, %c0_i32_0 : i32, i32
  }
  func.func @transform_5(%arg0: i32) -> (i32, i32, i32) {
    %c0_i32 = arith.constant 0 : i32
    %c0_i32_0 = arith.constant 0 : i32
    %c0_i32_1 = arith.constant 0 : i32
    return %arg0, %c0_i32, %c0_i32_0 : i32, i32, i32
  }
}

</mosaic_0001>

<bundles_post_ra>
// kernel: gcn_regr_forward.1
= control target key start
LH: loop header
LB: loop body
LE: loop exit
PB: predicated region body
PF: predicated region fallthrough
CT: control target
= control target key end

     0   :  { %s2542_s18 = smov 0   ;;  %s2919_s0 = inlined_call_operand.vmem [shape: f32[2,128,128], index: 0, kind: input, shape index: {}]   ;;  %s2920_s1 = inlined_call_operand.vmem [shape: f32[2,16,128], index: 1, kind: input, shape index: {}]   ;;  %s2921_s2 = inlined_call_operand.vmem [shape: f32[2,128,128], index: 2, kind: input, shape index: {}]   ;;  %s2922_s3 = inlined_call_operand.vmem [shape: f32[4,128,128], index: 3, kind: input, shape index: {}]   ;;  %s2923_s4 = inlined_call_operand.vmem [shape: f32[8,128], index: 4, kind: input, shape index: {}]   ;;  %s2924_s5 = inlined_call_operand.vmem [shape: f32[2,16,128], index: 5, kind: output, shape index: {}]  }
   0x1 LB: > { %s1535_s19 = sadd.s32 4294967295, %s2510_s18   ;;  %p1539_p0 = scmp.ge.s32.totalorder %s2510_s18, 1  ;;  %s2510_s18 = sphi %s2542_s18, %s15_s18  }
   0x2   : > { %p207_p1 = scmp.lt.s32.totalorder %s2510_s18, 3 }
   0x4   : > { %p208_p2 = pnand %p1539_p0, %p207_p1 }
   0x5   : > { %v297_v0 = vld [vmem:[%s2922_s3] sm:$0xff] (!%p208_p2)  ;;  %v298_v1 = vld [vmem:[%s2922_s3 + $0x8] sm:$0xff] (!%p208_p2)  ;;  %v299_v2 = vld [vmem:[%s2922_s3 + $0x10] sm:$0xff] (!%p208_p2)  ;;  %p245_p3 = scmp.lt.s32.totalorder (!%p208_p2), %s1535_s19, 1 }
   0x6   : > { %211 = sbr.rel (%p208_p2) target bundleno = 1898 (0x76a), region = 40  ;;  %v2240_v3 = vpack.c.bf16 (!%p208_p2), %v298_v1, %v297_v0  ;;  %v300_v4 = vld [vmem:[%s2922_s3 + $0x18] sm:$0xff] (!%p208_p2)  ;;  %v301_v6 = vld [vmem:[%s2922_s3 + $0x20] sm:$0xff] (!%p208_p2)  ;;  %v302_v7 = vld [vmem:[%s2922_s3 + $0x28] sm:$0xff] (!%p208_p2) }
   0x7   : > { %v2244_v5 = vpack.c.bf16 (!%p208_p2), %v300_v4, %v299_v2  ;;  %v2248_v8 = vpack.c.bf16 (!%p208_p2), %v302_v7, %v301_v6  ;;  %v303_v9 = vld [vmem:[%s2922_s3 + $0x30] sm:$0xff] (!%p208_p2)  ;;  %v304_v10 = vld [vmem:[%s2922_s3 + $0x38] sm:$0xff] (!%p208_p2)  ;;  %v305_v13 = vld [vmem:[%s2922_s3 + $0x40] sm:$0xff] (!%p208_p2) }
   0x8   : > { %2241 = vmatprep.subr.bf16.mxu0 (!%p208_p2), %v2240_v3  ;;  %v2252_v12 = vpack.c.bf16 (!%p208_p2), %v304_v10, %v303_v9  ;;  %v306_v14 = vld [vmem:[%s2922_s3 + $0x48] sm:$0xff] (!%p208_p2)  ;;  %v307_v16 = vld [vmem:[%s2922_s3 + $0x50] sm:$0xff] (!%p208_p2)  ;;  %v308_v17 = vld [vmem:[%s2922_s3 + $0x58] sm:$0xff] (!%p208_p2) }
   0x9   : > { %2243 = vmatpush3.bf16.msra.mxu0 (!%p208_p2), %v2240_v3  ;;  %v2256_v15 = vpack.c.bf16 (!%p208_p2), %v306_v14, %v305_v13  ;;  %v2260_v18 = vpack.c.bf16 (!%p208_p2), %v308_v17, %v307_v16  ;;  %v309_v19 = vld [vmem:[%s2922_s3 + $0x60] sm:$0xff] (!%p208_p2)  ;;  %v310_v20 = vld [vmem:[%s2922_s3 + $0x68] sm:$0xff] (!%p208_p2)  ;;  %v311_v22 = vld [vmem:[%s2922_s3 + $0x70] sm:$0xff] (!%p208_p2) }
   0xa   : > { %2245 = vmatprep.subr.bf16.mxu0 (!%p208_p2), %v2244_v5  ;;  %v2264_v21 = vpack.c.bf16 (!%p208_p2), %v310_v20, %v309_v19  ;;  %v312_v23 = vld [vmem:[%s2922_s3 + $0x78] sm:$0xff] (!%p208_p2)  ;;  %v1549_v41 = vld [vmem:[%s2922_s3 + $0x80] sm:$0xff] (!%p208_p2)  ;;  %v1550_v42 = vld [vmem:[%s2922_s3 + $0x88] sm:$0xff] (!%p208_p2) }
   0xb   : > { %v2268_v24 = vpack.c.bf16 (!%p208_p2), %v312_v23, %v311_v22  ;;  %v1551_v43 = vld [vmem:[%s2922_s3 + $0x90] sm:$0xff] (!%p208_p2)  ;;  %v2304_v44 = vpack.c.bf16 (!%p208_p2), %v1550_v42, %v1549_v41  ;;  %v1552_v45 = vld [vmem:[%s2922_s3 + $0x98] sm:$0xff] (!%p208_p2)  ;;  %v1553_v47 = vld [vmem:[%s2922_s3 + $0xa0] sm:$0xff] (!%p208_p2) }
   0xc   : > { %v2308_v46 = vpack.c.bf16 (!%p208_p2), %v1552_v45, %v1551_v43  ;;  %v1554_v48 = vld [vmem:[%s2922_s3 + $0xa8] sm:$0xff] (!%p208_p2)  ;;  %v1555_v50 = vld [vmem:[%s2922_s3 + $0xb0] sm:$0xff] (!%p208_p2)  ;;  %v1556_v51 = vld [vmem:[%s2922_s3 + $0xb8] sm:$0xff] (!%p208_p2) }
   0xd   : > { %s2926_s19 = smov (!%p245_p3, %s1535_s19), 1  ;;  %2247 = vmatpush3.bf16.msra.mxu0 %v2244_v5  ;;  %v2312_v49 = vpack.c.bf16 %v1554_v48, %v1553_v47  ;;  %v2316_v52 = vpack.c.bf16 %v1556_v51, %v1555_v50  ;;  %v1557_v53 = vld [vmem:[%s2922_s3 + $0xc0] sm:$0xff]  ;;  %v1558_v54 = vld [vmem:[%s2922_s3 + $0xc8] sm:$0xff]  ;;  %v1559_v56 = vld [vmem:[%s2922_s3 + $0xd0] sm:$0xff] }
   0xe   : > { %s1602_s7 = sshll.u32 %s2926_s19, 7  ;;  %2249 = vmatprep.subr.bf16.mxu0 %v2248_v8  ;;  %v2320_v55 = vpack.c.bf16 %v1558_v54, %v1557_v53  ;;  %v1560_v57 = vld [vmem:[%s2922_s3 + $0xd8] sm:$0xff]  ;;  %v1561_v59 = vld [vmem:[%s2922_s3 + $0xe0] sm:$0xff]  ;;  %v1562_v60 = vld [vmem:[%s2922_s3 + $0xe8] sm:$0xff]  ;;  %s1603_s13 = sshll.u32 %s2926_s19, 4 }
   0xf   : > { %s2576_s10 = scalar_lea.vmem %s2921_s2, %s1602_s7  ;;  %s2629_s12 = scalar_lea.vmem %s2919_s0, %s1602_s7  ;;  %v2324_v58 = vpack.c.bf16 %v1560_v57, %v1559_v56  ;;  %v2328_v61 = vpack.c.bf16 %v1562_v60, %v1561_v59  ;;  %v1548_v41 = vld [vmem:[%s2923_s4] ss:$0 sm:$0xff] }
  0x10   : > { %v281_v11 = vld [vmem:[%s2576_s10] sm:$0xff]  ;;  %v282_v25 = vld [vmem:[%s2576_s10 + $0x8] sm:$0xff]  ;;  %v283_v26 = vld [vmem:[%s2576_s10 + $0x10] sm:$0xff]  ;;  %s2835_s16 = scalar_lea.vmem %s2920_s1, %s1603_s13  ;;  %s264_s9 = scalar_lea.vmem %s2924_s5, %s1603_s13 }
  0x11   : > { %1866 = vmatprep.mubr.f32.mxu0 %v281_v11  ;;  %2251 = vmatpush3.bf16.msra.mxu0 %v2248_v8  ;;  %v284_v27 = vld [vmem:[%s2576_s10 + $0x18] sm:$0xff]  ;;  %v285_v28 = vld [vmem:[%s2576_s10 + $0x20] sm:$0xff]  ;;  %v286_v29 = vld [vmem:[%s2576_s10 + $0x28] sm:$0xff] }
  0x12   : > { %2253 = vmatprep.subr.bf16.mxu0 %v2252_v12  ;;  %v287_v30 = vld [vmem:[%s2576_s10 + $0x30] sm:$0xff]  ;;  %v288_v31 = vld [vmem:[%s2576_s10 + $0x38] sm:$0xff]  ;;  %v289_v32 = vld [vmem:[%s2576_s10 + $0x40] sm:$0xff] }
  0x13   : > { %v290_v33 = vld [vmem:[%s2576_s10 + $0x48] sm:$0xff]  ;;  %v291_v34 = vld [vmem:[%s2576_s10 + $0x50] sm:$0xff]  ;;  %v292_v35 = vld [vmem:[%s2576_s10 + $0x58] sm:$0xff] }
  0x14   : > { %v293_v36 = vld [vmem:[%s2576_s10 + $0x60] sm:$0xff]  ;;  %v294_v37 = vld [vmem:[%s2576_s10 + $0x68] sm:$0xff]  ;;  %v295_v38 = vld [vmem:[%s2576_s10 + $0x70] sm:$0xff] }
  0x15   : > { %2255 = vmatpush3.bf16.msra.mxu0 %v2252_v12  ;;  %v296_v39 = vld [vmem:[%s2576_s10 + $0x78] sm:$0xff]  ;;  %v2632_v40 = vld [vmem:[%s2629_s12] sm:$0xff]  ;;  %v2678_v22 = vld [vmem:[%s2629_s12 + $0x8] sm:$0xff] }
  0x16   : > { %2257 = vmatprep.subr.bf16.mxu0 %v2256_v15  ;;  %1922 = vmatprep.mubr.f32.mxu1 %v2632_v40  ;;  %v2681_v23 = vld [vmem:[%s2629_s12 + $0x10] sm:$0xff] }
  0x19   : > { %2259 = vmatpush3.bf16.msra.mxu0 %v2256_v15 }
  0x1a   : > { %2261 = vmatprep.subr.bf16.mxu0 %v2260_v18 }
  0x1d   : > { %2263 = vmatpush3.bf16.msra.mxu0 %v2260_v18 }
  0x1e   : > { %2265 = vmatprep.subr.bf16.mxu0 %v2264_v21 }
  0x21   : > { %2267 = vmatpush3.bf16.msra.mxu0 %v2264_v21 }
  0x22   : > { %2269 = vmatprep.subr.bf16.mxu0 %v2268_v24 }
  0x25   : > { %2271 = vmatpush3.bf16.msra.mxu0 %v2268_v24  ;;  %v2686_v24 = vld [vmem:[%s2629_s12 + $0x18] sm:$0xff] }
  0x26   : > { %2305 = vmatprep.subr.bf16.mxu0 %v2304_v44 }
  0x28   : > { %1867 = vmatmul.mubr.f32.vlgmr.msra.gmra.mrb[0].mxu0 %v282_v25  ;;  %v2689_v25 = vld [vmem:[%s2629_s12 + $0x20] sm:$0xff] }
  0x29   : > { %1869 = vmatprep.mubr.f32.mxu0 %v283_v26  ;;  %2307 = vmatpush3.bf16.msra.mxu0 %v2304_v44  ;;  %v2694_v26 = vld [vmem:[%s2629_s12 + $0x28] sm:$0xff] }
  0x2a   : > { %2309 = vmatprep.subr.bf16.mxu0 %v2308_v46 }
  0x2c   : > { %1870 = vmatmul.mubr.f32.gmra.mrb[2].mxu0 %v284_v27  ;;  %v2697_v27 = vld [vmem:[%s2629_s12 + $0x30] sm:$0xff] }
  0x2d   : > { %1872 = vmatprep.mubr.f32.mxu0 %v285_v28  ;;  %2311 = vmatpush3.bf16.msra.mxu0 %v2308_v46  ;;  %v2702_v28 = vld [vmem:[%s2629_s12 + $0x38] sm:$0xff] }
  0x2e   : > { %2313 = vmatprep.subr.bf16.mxu0 %v2312_v49 }
  0x30   : > { %1873 = vmatmul.mubr.f32.gmra.mrb[4].mxu0 %v286_v29  ;;  %v2705_v29 = vld [vmem:[%s2629_s12 + $0x40] sm:$0xff] }
  0x31   : > { %1875 = vmatprep.mubr.f32.mxu0 %v287_v30  ;;  %2315 = vmatpush3.bf16.msra.mxu0 %v2312_v49  ;;  %v2710_v30 = vld [vmem:[%s2629_s12 + $0x48] sm:$0xff] }
  0x32   : > { %2317 = vmatprep.subr.bf16.mxu0 %v2316_v52 }
  0x34   : > { %1876 = vmatmul.mubr.f32.gmra.mrb[6].mxu0 %v288_v31  ;;  %v2713_v31 = vld [vmem:[%s2629_s12 + $0x50] sm:$0xff] }
  0x35   : > { %1878 = vmatprep.mubr.f32.mxu0 %v289_v32  ;;  %2319 = vmatpush3.bf16.msra.mxu0 %v2316_v52  ;;  %v2718_v32 = vld [vmem:[%s2629_s12 + $0x58] sm:$0xff] }
  0x36   : > { %2321 = vmatprep.subr.bf16.mxu0 %v2320_v55 }
  0x38   : > { %1879 = vmatmul.mubr.f32.gmra.mrb[8].mxu0 %v290_v33  ;;  %v2721_v33 = vld [vmem:[%s2629_s12 + $0x60] sm:$0xff] }
  0x39   : > { %1881 = vmatprep.mubr.f32.mxu0 %v291_v34  ;;  %2323 = vmatpush3.bf16.msra.mxu0 %v2320_v55  ;;  %v2726_v34 = vld [vmem:[%s2629_s12 + $0x68] sm:$0xff] }
  0x3a   : > { %2325 = vmatprep.subr.bf16.mxu0 %v2324_v58 }
  0x3c   : > { %1882 = vmatmul.mubr.f32.gmra.mrb[10].mxu0 %v292_v35  ;;  %v2729_v35 = vld [vmem:[%s2629_s12 + $0x70] sm:$0xff] }
  0x3d   : > { %1884 = vmatprep.mubr.f32.mxu0 %v293_v36  ;;  %2327 = vmatpush3.bf16.msra.mxu0 %v2324_v58  ;;  %v2734_v36 = vld [vmem:[%s2629_s12 + $0x78] sm:$0xff] }
  0x3e   : > { %2329 = vmatprep.subr.bf16.mxu0 %v2328_v61 }
  0x40   : > { %1885 = vmatmul.mubr.f32.gmra.mrb[12].mxu0 %v294_v37  ;;  %v1563_v37 = vld [vmem:[%s2922_s3 + $0xf0] sm:$0xff] }
  0x41   : > { %1887 = vmatprep.mubr.f32.mxu0 %v295_v38  ;;  %2331 = vmatpush3.bf16.msra.mxu0 %v2328_v61  ;;  %v1564_v38 = vld [vmem:[%s2922_s3 + $0xf8] sm:$0xff] }
  0x44   : > { %1888 = vmatmul.mubr.f32.gmra.mrb[14].mxu0 %v296_v39  ;;  %v2332_v39 = vpack.c.bf16 %v1564_v38, %v1563_v37 }
  0x46   : > { %2333 = vmatprep.subr.bf16.mxu0 %v2332_v39 }
  0x47   : > { %2335 = vmatpush3.bf16.msra.mxu0 %v2332_v39 }
  0xfb   : > { %v1868_v62 = vpop.f32.mrb[0].mxu0 }
  0xfc   : > { %v379_v63 = vpop.f32.mrb[1].mxu0 }
  0xfd   : > { %v2272_v0 = vpack.c.bf16 %v1868_v62, %v379_v63 }
  0xff   : > { %v1871_v1 = vpop.f32.mrb[2].mxu0  ;;  %2273 = vmatprep.subr.bf16.mxu1 %v2272_v0 }
 0x100   : > { %v389_v2 = vpop.f32.mrb[3].mxu0  ;;  %2275 = vmatpush3.bf16.msra.mxu1 %v2272_v0 }
 0x101   : > { %v2276_v3 = vpack.c.bf16 %v1871_v1, %v389_v2 }
 0x103   : > { %v1874_v4 = vpop.f32.mrb[4].mxu0  ;;  %2277 = vmatprep.subr.bf16.mxu1 %v2276_v3 }
 0x104   : > { %v399_v5 = vpop.f32.mrb[5].mxu0  ;;  %2279 = vmatpush3.bf16.msra.mxu1 %v2276_v3 }
 0x105   : > { %v2280_v6 = vpack.c.bf16 %v1874_v4, %v399_v5 }
 0x107   : > { %v1877_v7 = vpop.f32.mrb[6].mxu0  ;;  %2281 = vmatprep.subr.bf16.mxu1 %v2280_v6 }
 0x108   : > { %v409_v8 = vpop.f32.mrb[7].mxu0  ;;  %2283 = vmatpush3.bf16.msra.mxu1 %v2280_v6 }
 0x109   : > { %v2284_v9 = vpack.c.bf16 %v1877_v7, %v409_v8 }
 0x10b   : > { %v1880_v10 = vpop.f32.mrb[8].mxu0  ;;  %2285 = vmatprep.subr.bf16.mxu1 %v2284_v9 }
 0x10c   : > { %v419_v11 = vpop.f32.mrb[9].mxu0  ;;  %2287 = vmatpush3.bf16.msra.mxu1 %v2284_v9 }
 0x10d   : > { %v2288_v12 = vpack.c.bf16 %v1880_v10, %v419_v11 }
 0x10f   : > { %v1883_v13 = vpop.f32.mrb[10].mxu0  ;;  %2289 = vmatprep.subr.bf16.mxu1 %v2288_v12 }
 0x110   : > { %v429_v14 = vpop.f32.mrb[11].mxu0  ;;  %2291 = vmatpush3.bf16.msra.mxu1 %v2288_v12 }
 0x111   : > { %v2292_v15 = vpack.c.bf16 %v1883_v13, %v429_v14 }
 0x113   : > { %v1886_v16 = vpop.f32.mrb[12].mxu0  ;;  %2293 = vmatprep.subr.bf16.mxu1 %v2292_v15 }
 0x114   : > { %v439_v17 = vpop.f32.mrb[13].mxu0  ;;  %2295 = vmatpush3.bf16.msra.mxu1 %v2292_v15 }
 0x115   : > { %v2296_v18 = vpack.c.bf16 %v1886_v16, %v439_v17 }
 0x117   : > { %v1889_v19 = vpop.f32.mrb[14].mxu0  ;;  %2297 = vmatprep.subr.bf16.mxu1 %v2296_v18 }
 0x118   : > { %v449_v20 = vpop.f32.mrb[15].mxu0  ;;  %2299 = vmatpush3.bf16.msra.mxu1 %v2296_v18 }
 0x119   : > { %v2300_v21 = vpack.c.bf16 %v1889_v19, %v449_v20 }
 0x11b   : > { %2301 = vmatprep.subr.bf16.mxu1 %v2300_v21 }
 0x11c   : > { %2303 = vmatpush3.bf16.msra.mxu1 %v2300_v21 }
 0x11f   : > { %1923 = vmatmul.mubr.f32.vlgmr.msra.gmra.mrb[0].mxu1 %v2678_v22 }
 0x120   : > { %1925 = vmatprep.mubr.f32.mxu1 %v2681_v23 }
 0x123   : > { %1926 = vmatmul.mubr.f32.gmra.mrb[2].mxu1 %v2686_v24 }
 0x124   : > { %1928 = vmatprep.mubr.f32.mxu1 %v2689_v25 }
 0x127   : > { %1929 = vmatmul.mubr.f32.gmra.mrb[4].mxu1 %v2694_v26 }
 0x128   : > { %1931 = vmatprep.mubr.f32.mxu1 %v2697_v27 }
 0x12b   : > { %1932 = vmatmul.mubr.f32.gmra.mrb[6].mxu1 %v2702_v28 }
 0x12c   : > { %1934 = vmatprep.mubr.f32.mxu1 %v2705_v29 }
 0x12f   : > { %1935 = vmatmul.mubr.f32.gmra.mrb[8].mxu1 %v2710_v30 }
 0x130   : > { %1937 = vmatprep.mubr.f32.mxu1 %v2713_v31 }
 0x133   : > { %1938 = vmatmul.mubr.f32.gmra.mrb[10].mxu1 %v2718_v32 }
 0x134   : > { %1940 = vmatprep.mubr.f32.mxu1 %v2721_v33 }
 0x137   : > { %1941 = vmatmul.mubr.f32.gmra.mrb[12].mxu1 %v2726_v34 }
 0x138   : > { %1943 = vmatprep.mubr.f32.mxu1 %v2729_v35 }
 0x13b   : > { %1944 = vmatmul.mubr.f32.gmra.mrb[14].mxu1 %v2734_v36 }
 0x13c   : > { %2034 = vmatprep.mubr.f32.mxu1 %v2632_v40 }
 0x1f2   : > { %v1924_v42 = vpop.f32.mrb[0].mxu1 }
 0x1f3   : > { %v535_v43 = vadd.f32 %v1924_v42, %v1548_v41  ;;  %v529_v44 = vpop.f32.mrb[1].mxu1 }
 0x1f4   : > { %v530_v45 = vadd.f32 %v1548_v41, %v529_v44  ;;  %v1567_v44 = vld [vmem:[%s2922_s3 + $0x108] sm:$0xff] }
 0x1f5   : > { %v609_v48 = vmax.f32 %v535_v43, 0.0  ;;  %v1566_v43 = vld [vmem:[%s2922_s3 + $0x100] sm:$0xff] }
 0x1f6   : > { %v608_v46 = vmax.f32 %v530_v45, 0.0  ;;  %v1927_v47 = vpop.f32.mrb[2].mxu1  ;;  %v1568_v45 = vld [vmem:[%s2922_s3 + $0x110] sm:$0xff] }
 0x1f7   : > { %v545_v49 = vadd.f32 %v1927_v47, %v1548_v41  ;;  %v539_v50 = vpop.f32.mrb[3].mxu1 }
 0x1f8   : > { %v540_v51 = vadd.f32 %v1548_v41, %v539_v50  ;;  %1978 = vmatprep.mubr.f32.mxu0 %v608_v46  ;;  %v2368_v46 = vpack.c.bf16 %v1567_v44, %v1566_v43  ;;  %v1565_v43 = vld [vmem:[%s2923_s4 + $0x1] ss:$0 sm:$0xff] }
 0x1f9   : > { %1979 = vmatmul.mubr.f32.vlgmr.msra.gmra.mrb[16].mxu0 %v609_v48  ;;  %v611_v54 = vmax.f32 %v545_v49, 0.0  ;;  %v1570_v48 = vld [vmem:[%s2922_s3 + $0x120] sm:$0xff]  ;;  %v1571_v49 = vld [vmem:[%s2922_s3 + $0x128] sm:$0xff] }
 0x1fa   : > { %v610_v52 = vmax.f32 %v540_v51, 0.0  ;;  %v1930_v53 = vpop.f32.mrb[4].mxu1  ;;  %2369 = vmatprep.subr.bf16.mxu0 %v2368_v46  ;;  %v2376_v50 = vpack.c.bf16 %v1571_v49, %v1570_v48  ;;  %v1572_v51 = vld [vmem:[%s2922_s3 + $0x130] sm:$0xff] }
 0x1fb   : > { %v555_v55 = vadd.f32 %v1930_v53, %v1548_v41  ;;  %v549_v56 = vpop.f32.mrb[5].mxu1  ;;  %2371 = vmatpush3.bf16.msra.mxu0 %v2368_v46 }
 0x1fc   : > { %v550_v57 = vadd.f32 %v1548_v41, %v549_v56  ;;  %1981 = vmatprep.mubr.f32.mxu0 %v610_v52  ;;  %v1573_v52 = vld [vmem:[%s2922_s3 + $0x138] sm:$0xff] }
 0x1fd   : > { %1982 = vmatmul.mubr.f32.gmra.mrb[18].mxu0 %v611_v54  ;;  %v613_v60 = vmax.f32 %v555_v55, 0.0  ;;  %v2380_v53 = vpack.c.bf16 %v1573_v52, %v1572_v51  ;;  %v1574_v54 = vld [vmem:[%s2922_s3 + $0x140] sm:$0xff]  ;;  %v1575_v55 = vld [vmem:[%s2922_s3 + $0x148] sm:$0xff] }
 0x1fe   : > { %v612_v58 = vmax.f32 %v550_v57, 0.0  ;;  %v1933_v59 = vpop.f32.mrb[6].mxu1  ;;  %v2384_v56 = vpack.c.bf16 %v1575_v55, %v1574_v54  ;;  %v1576_v57 = vld [vmem:[%s2922_s3 + $0x150] sm:$0xff] }
 0x1ff   : > { %v565_v61 = vadd.f32 %v1933_v59, %v1548_v41  ;;  %v559_v62 = vpop.f32.mrb[7].mxu1 }
 0x200   : > { %v560_v63 = vadd.f32 %v1548_v41, %v559_v62  ;;  %1984 = vmatprep.mubr.f32.mxu0 %v612_v58  ;;  %v1577_v58 = vld [vmem:[%s2922_s3 + $0x158] sm:$0xff] }
 0x201   : > { %1985 = vmatmul.mubr.f32.gmra.mrb[20].mxu0 %v613_v60  ;;  %v615_v2 = vmax.f32 %v565_v61, 0.0  ;;  %v2388_v59 = vpack.c.bf16 %v1577_v58, %v1576_v57  ;;  %v1578_v60 = vld [vmem:[%s2922_s3 + $0x160] sm:$0xff]  ;;  %v1579_v61 = vld [vmem:[%s2922_s3 + $0x168] sm:$0xff] }
 0x202   : > { %v614_v0 = vmax.f32 %v560_v63, 0.0  ;;  %v1936_v1 = vpop.f32.mrb[8].mxu1  ;;  %v2392_v62 = vpack.c.bf16 %v1579_v61, %v1578_v60 }
 0x203   : > { %v575_v3 = vadd.f32 %v1936_v1, %v1548_v41  ;;  %v569_v4 = vpop.f32.mrb[9].mxu1 }
 0x204   : > { %v570_v5 = vadd.f32 %v1548_v41, %v569_v4  ;;  %1987 = vmatprep.mubr.f32.mxu0 %v614_v0 }
 0x205   : > { %1988 = vmatmul.mubr.f32.gmra.mrb[22].mxu0 %v615_v2  ;;  %v617_v8 = vmax.f32 %v575_v3, 0.0 }
 0x206   : > { %v616_v6 = vmax.f32 %v570_v5, 0.0  ;;  %v1939_v7 = vpop.f32.mrb[10].mxu1 }
 0x207   : > { %v585_v9 = vadd.f32 %v1939_v7, %v1548_v41  ;;  %v579_v10 = vpop.f32.mrb[11].mxu1 }
 0x208   : > { %v580_v11 = vadd.f32 %v1548_v41, %v579_v10  ;;  %1990 = vmatprep.mubr.f32.mxu0 %v616_v6 }
 0x209   : > { %1991 = vmatmul.mubr.f32.gmra.mrb[24].mxu0 %v617_v8  ;;  %v619_v14 = vmax.f32 %v585_v9, 0.0 }
 0x20a   : > { %v618_v12 = vmax.f32 %v580_v11, 0.0  ;;  %v1942_v13 = vpop.f32.mrb[12].mxu1 }
 0x20b   : > { %v595_v15 = vadd.f32 %v1942_v13, %v1548_v41  ;;  %v589_v16 = vpop.f32.mrb[13].mxu1 }
 0x20c   : > { %v590_v17 = vadd.f32 %v1548_v41, %v589_v16  ;;  %1993 = vmatprep.mubr.f32.mxu0 %v618_v12 }
 0x20d   : > { %1994 = vmatmul.mubr.f32.gmra.mrb[26].mxu0 %v619_v14  ;;  %v621_v20 = vmax.f32 %v595_v15, 0.0 }
 0x20e   : > { %v620_v18 = vmax.f32 %v590_v17, 0.0  ;;  %v1945_v19 = vpop.f32.mrb[14].mxu1 }
 0x20f   : > { %v605_v21 = vadd.f32 %v1945_v19, %v1548_v41  ;;  %v599_v37 = vpop.f32.mrb[15].mxu1 }
 0x210   : > { %v600_v38 = vadd.f32 %v1548_v41, %v599_v37  ;;  %1996 = vmatprep.mubr.f32.mxu0 %v620_v18  ;;  %v1569_v41 = vld [vmem:[%s2922_s3 + $0x118] sm:$0xff] }
 0x211   : > { %1997 = vmatmul.mubr.f32.gmra.mrb[28].mxu0 %v621_v20  ;;  %v623_v42 = vmax.f32 %v605_v21, 0.0  ;;  %v2372_v47 = vpack.c.bf16 %v1569_v41, %v1568_v45 }
 0x212   : > { %v622_v39 = vmax.f32 %v600_v38, 0.0  ;;  %v1580_v38 = vld [vmem:[%s2922_s3 + $0x170] sm:$0xff] }
 0x213   : > { %2373 = vmatprep.subr.bf16.mxu0 %v2372_v47 }
 0x214   : > { %1999 = vmatprep.mubr.f32.mxu0 %v622_v39  ;;  %2375 = vmatpush3.bf16.msra.mxu0 %v2372_v47  ;;  %v1581_v39 = vld [vmem:[%s2922_s3 + $0x178] sm:$0xff] }
 0x215   : > { %2000 = vmatmul.mubr.f32.gmra.mrb[30].mxu0 %v623_v42  ;;  %2377 = vmatprep.subr.bf16.mxu0 %v2376_v50  ;;  %v2396_v42 = vpack.c.bf16 %v1581_v39, %v1580_v38 }
 0x218   : > { %2379 = vmatpush3.bf16.msra.mxu0 %v2376_v50 }
 0x219   : > { %2381 = vmatprep.subr.bf16.mxu0 %v2380_v53 }
 0x21c   : > { %2383 = vmatpush3.bf16.msra.mxu0 %v2380_v53 }
 0x21d   : > { %2385 = vmatprep.subr.bf16.mxu0 %v2384_v56 }
 0x220   : > { %2387 = vmatpush3.bf16.msra.mxu0 %v2384_v56 }
 0x221   : > { %2389 = vmatprep.subr.bf16.mxu0 %v2388_v59 }
 0x224   : > { %2391 = vmatpush3.bf16.msra.mxu0 %v2388_v59 }
 0x225   : > { %2393 = vmatprep.subr.bf16.mxu0 %v2392_v62 }
 0x228   : > { %2395 = vmatpush3.bf16.msra.mxu0 %v2392_v62 }
 0x229   : > { %2397 = vmatprep.subr.bf16.mxu0 %v2396_v42 }
 0x22c   : > { %2399 = vmatpush3.bf16.msra.mxu0 %v2396_v42 }
 0x2cc   : > { %v1980_v63 = vpop.f32.mrb[16].mxu0 }
 0x2cd   : > { %v707_v0 = vpop.f32.mrb[17].mxu0 }
 0x2ce   : > { %v2336_v1 = vpack.c.bf16 %v1980_v63, %v707_v0 }
 0x2d0   : > { %v1983_v2 = vpop.f32.mrb[18].mxu0  ;;  %2337 = vmatprep.subr.bf16.mxu1 %v2336_v1 }
 0x2d1   : > { %v717_v3 = vpop.f32.mrb[19].mxu0  ;;  %2339 = vmatpush3.bf16.msra.mxu1 %v2336_v1 }
 0x2d2   : > { %v2340_v4 = vpack.c.bf16 %v1983_v2, %v717_v3 }
 0x2d4   : > { %v1986_v5 = vpop.f32.mrb[20].mxu0  ;;  %2341 = vmatprep.subr.bf16.mxu1 %v2340_v4 }
 0x2d5   : > { %v727_v6 = vpop.f32.mrb[21].mxu0  ;;  %2343 = vmatpush3.bf16.msra.mxu1 %v2340_v4 }
 0x2d6   : > { %v2344_v7 = vpack.c.bf16 %v1986_v5, %v727_v6 }
 0x2d8   : > { %v1989_v8 = vpop.f32.mrb[22].mxu0  ;;  %2345 = vmatprep.subr.bf16.mxu1 %v2344_v7 }
 0x2d9   : > { %v737_v9 = vpop.f32.mrb[23].mxu0  ;;  %2347 = vmatpush3.bf16.msra.mxu1 %v2344_v7 }
 0x2da   : > { %v2348_v10 = vpack.c.bf16 %v1989_v8, %v737_v9 }
 0x2dc   : > { %v1992_v11 = vpop.f32.mrb[24].mxu0  ;;  %2349 = vmatprep.subr.bf16.mxu1 %v2348_v10 }
 0x2dd   : > { %v747_v12 = vpop.f32.mrb[25].mxu0  ;;  %2351 = vmatpush3.bf16.msra.mxu1 %v2348_v10 }
 0x2de   : > { %v2352_v13 = vpack.c.bf16 %v1992_v11, %v747_v12 }
 0x2e0   : > { %v1995_v14 = vpop.f32.mrb[26].mxu0  ;;  %2353 = vmatprep.subr.bf16.mxu1 %v2352_v13 }
 0x2e1   : > { %v757_v15 = vpop.f32.mrb[27].mxu0  ;;  %2355 = vmatpush3.bf16.msra.mxu1 %v2352_v13 }
 0x2e2   : > { %v2356_v16 = vpack.c.bf16 %v1995_v14, %v757_v15 }
 0x2e4   : > { %v1998_v17 = vpop.f32.mrb[28].mxu0  ;;  %2357 = vmatprep.subr.bf16.mxu1 %v2356_v16 }
 0x2e5   : > { %v767_v18 = vpop.f32.mrb[29].mxu0  ;;  %2359 = vmatpush3.bf16.msra.mxu1 %v2356_v16 }
 0x2e6   : > { %v2360_v19 = vpack.c.bf16 %v1998_v17, %v767_v18 }
 0x2e8   : > { %v2001_v20 = vpop.f32.mrb[30].mxu0  ;;  %2361 = vmatprep.subr.bf16.mxu1 %v2360_v19 }
 0x2e9   : > { %v777_v21 = vpop.f32.mrb[31].mxu0  ;;  %2363 = vmatpush3.bf16.msra.mxu1 %v2360_v19 }
 0x2ea   : > { %v2364_v37 = vpack.c.bf16 %v2001_v20, %v777_v21 }
 0x2ec   : > { %2365 = vmatprep.subr.bf16.mxu1 %v2364_v37 }
 0x2ed   : > { %2367 = vmatpush3.bf16.msra.mxu1 %v2364_v37 }
 0x2f0   : > { %2035 = vmatmul.mubr.f32.vlgmr.msra.gmra.mrb[16].mxu1 %v2678_v22 }
 0x2f1   : > { %2037 = vmatprep.mubr.f32.mxu1 %v2681_v23 }
 0x2f4   : > { %2038 = vmatmul.mubr.f32.gmra.mrb[18].mxu1 %v2686_v24 }
 0x2f5   : > { %2040 = vmatprep.mubr.f32.mxu1 %v2689_v25 }
 0x2f8   : > { %2041 = vmatmul.mubr.f32.gmra.mrb[20].mxu1 %v2694_v26 }
 0x2f9   : > { %2043 = vmatprep.mubr.f32.mxu1 %v2697_v27 }
 0x2fc   : > { %2044 = vmatmul.mubr.f32.gmra.mrb[22].mxu1 %v2702_v28 }
 0x2fd   : > { %2046 = vmatprep.mubr.f32.mxu1 %v2705_v29 }
 0x300   : > { %2047 = vmatmul.mubr.f32.gmra.mrb[24].mxu1 %v2710_v30 }
 0x301   : > { %2049 = vmatprep.mubr.f32.mxu1 %v2713_v31 }
 0x304   : > { %2050 = vmatmul.mubr.f32.gmra.mrb[26].mxu1 %v2718_v32 }
 0x305   : > { %2052 = vmatprep.mubr.f32.mxu1 %v2721_v33 }
 0x308   : > { %2053 = vmatmul.mubr.f32.gmra.mrb[28].mxu1 %v2726_v34 }
 0x309   : > { %2055 = vmatprep.mubr.f32.mxu1 %v2729_v35 }
 0x30c   : > { %2056 = vmatmul.mubr.f32.gmra.mrb[30].mxu1 %v2734_v36 }
 0x30d   : > { %2146 = vmatprep.mubr.f32.mxu1 %v2632_v40 }
 0x3c3   : > { %v2036_v44 = vpop.f32.mrb[16].mxu1 }
 0x3c4   : > { %v863_v45 = vadd.f32 %v2036_v44, %v1565_v43  ;;  %v857_v46 = vpop.f32.mrb[17].mxu1 }
 0x3c5   : > { %v858_v41 = vadd.f32 %v1565_v43, %v857_v46 }
 0x3c6   : > { %v937_v48 = vmax.f32 %v863_v45, 0.0 }
 0x3c7   : > { %v936_v40 = vmax.f32 %v858_v41, 0.0  ;;  %v2039_v47 = vpop.f32.mrb[18].mxu1 }
 0x3c8   : > { %v873_v49 = vadd.f32 %v2039_v47, %v1565_v43  ;;  %v867_v50 = vpop.f32.mrb[19].mxu1 }
 0x3c9   : > { %v868_v51 = vadd.f32 %v1565_v43, %v867_v50  ;;  %2090 = vmatprep.mubr.f32.mxu0 %v936_v40 }
 0x3ca   : > { %2091 = vmatmul.mubr.f32.vlgmr.msra.gmra.mrb[32].mxu0 %v937_v48  ;;  %v939_v54 = vmax.f32 %v873_v49, 0.0 }
 0x3cb   : > { %v938_v52 = vmax.f32 %v868_v51, 0.0  ;;  %v2042_v53 = vpop.f32.mrb[20].mxu1 }
 0x3cc   : > { %v883_v55 = vadd.f32 %v2042_v53, %v1565_v43  ;;  %v877_v56 = vpop.f32.mrb[21].mxu1 }
 0x3cd   : > { %v878_v57 = vadd.f32 %v1565_v43, %v877_v56  ;;  %2093 = vmatprep.mubr.f32.mxu0 %v938_v52 }
 0x3ce   : > { %2094 = vmatmul.mubr.f32.gmra.mrb[34].mxu0 %v939_v54  ;;  %v941_v60 = vmax.f32 %v883_v55, 0.0 }
 0x3cf   : > { %v940_v58 = vmax.f32 %v878_v57, 0.0  ;;  %v2045_v59 = vpop.f32.mrb[22].mxu1 }
 0x3d0   : > { %v893_v61 = vadd.f32 %v2045_v59, %v1565_v43  ;;  %v887_v62 = vpop.f32.mrb[23].mxu1 }
 0x3d1   : > { %v888_v63 = vadd.f32 %v1565_v43, %v887_v62  ;;  %2096 = vmatprep.mubr.f32.mxu0 %v940_v58 }
 0x3d2   : > { %2097 = vmatmul.mubr.f32.gmra.mrb[36].mxu0 %v941_v60  ;;  %v943_v2 = vmax.f32 %v893_v61, 0.0 }
 0x3d3   : > { %v942_v0 = vmax.f32 %v888_v63, 0.0  ;;  %v2048_v1 = vpop.f32.mrb[24].mxu1 }
 0x3d4   : > { %v903_v3 = vadd.f32 %v2048_v1, %v1565_v43  ;;  %v897_v4 = vpop.f32.mrb[25].mxu1 }
 0x3d5   : > { %v898_v5 = vadd.f32 %v1565_v43, %v897_v4  ;;  %2099 = vmatprep.mubr.f32.mxu0 %v942_v0 }
 0x3d6   : > { %2100 = vmatmul.mubr.f32.gmra.mrb[38].mxu0 %v943_v2  ;;  %v945_v8 = vmax.f32 %v903_v3, 0.0  ;;  %v1593_v2 = vld [vmem:[%s2922_s3 + $0x1d0] sm:$0xff]  ;;  %v1594_v3 = vld [vmem:[%s2922_s3 + $0x1d8] sm:$0xff] }
 0x3d7   : > { %v944_v6 = vmax.f32 %v898_v5, 0.0  ;;  %v2051_v7 = vpop.f32.mrb[26].mxu1  ;;  %v2484_v4 = vpack.c.bf16 %v1594_v3, %v1593_v2  ;;  %v1595_v5 = vld [vmem:[%s2922_s3 + $0x1e0] sm:$0xff] }
 0x3d8   : > { %v913_v9 = vadd.f32 %v2051_v7, %v1565_v43  ;;  %v907_v10 = vpop.f32.mrb[27].mxu1 }
 0x3d9   : > { %v908_v11 = vadd.f32 %v1565_v43, %v907_v10  ;;  %2102 = vmatprep.mubr.f32.mxu0 %v944_v6  ;;  %v1596_v6 = vld [vmem:[%s2922_s3 + $0x1e8] sm:$0xff] }
 0x3da   : > { %2103 = vmatmul.mubr.f32.gmra.mrb[40].mxu0 %v945_v8  ;;  %v947_v14 = vmax.f32 %v913_v9, 0.0  ;;  %v2488_v7 = vpack.c.bf16 %v1596_v6, %v1595_v5  ;;  %v1597_v8 = vld [vmem:[%s2922_s3 + $0x1f0] sm:$0xff]  ;;  %v1598_v9 = vld [vmem:[%s2922_s3 + $0x1f8] sm:$0xff] }
 0x3db   : > { %v946_v12 = vmax.f32 %v908_v11, 0.0  ;;  %v2054_v13 = vpop.f32.mrb[28].mxu1  ;;  %v2492_v10 = vpack.c.bf16 %v1598_v9, %v1597_v8  ;;  %v2889_v11 = vld [vmem:[%s2923_s4 + $0x2] ss:$0 sm:$0xff] }
 0x3dc   : > { %v923_v15 = vadd.f32 %v2054_v13, %v1565_v43  ;;  %v917_v16 = vpop.f32.mrb[29].mxu1 }
 0x3dd   : > { %v918_v17 = vadd.f32 %v1565_v43, %v917_v16  ;;  %2105 = vmatprep.mubr.f32.mxu0 %v946_v12 }
 0x3de   : > { %2106 = vmatmul.mubr.f32.gmra.mrb[42].mxu0 %v947_v14  ;;  %v949_v20 = vmax.f32 %v923_v15, 0.0 }
 0x3df   : > { %v948_v18 = vmax.f32 %v918_v17, 0.0  ;;  %v2057_v19 = vpop.f32.mrb[30].mxu1 }
 0x3e0   : > { %v933_v21 = vadd.f32 %v2057_v19, %v1565_v43  ;;  %v927_v37 = vpop.f32.mrb[31].mxu1 }
 0x3e1   : > { %v928_v38 = vadd.f32 %v1565_v43, %v927_v37  ;;  %2108 = vmatprep.mubr.f32.mxu0 %v948_v18 }
 0x3e2   : > { %2109 = vmatmul.mubr.f32.gmra.mrb[44].mxu0 %v949_v20  ;;  %v951_v42 = vmax.f32 %v933_v21, 0.0 }
 0x3e3   : > { %v950_v39 = vmax.f32 %v928_v38, 0.0 }
 0x3e5   : > { %2111 = vmatprep.mubr.f32.mxu0 %v950_v39 }
 0x3e6   : > { %2112 = vmatmul.mubr.f32.gmra.mrb[46].mxu0 %v951_v42 }
 0x49d   : > { %v2092_v44 = vpop.f32.mrb[32].mxu0 }
 0x49e   : > { %v1035_v45 = vpop.f32.mrb[33].mxu0 }
 0x49f   : > { %v2400_v46 = vpack.c.bf16 %v2092_v44, %v1035_v45 }
 0x4a1   : > { %v2095_v41 = vpop.f32.mrb[34].mxu0  ;;  %2401 = vmatprep.subr.bf16.mxu1 %v2400_v46 }
 0x4a2   : > { %v1045_v40 = vpop.f32.mrb[35].mxu0  ;;  %2403 = vmatpush3.bf16.msra.mxu1 %v2400_v46 }
 0x4a3   : > { %v2404_v47 = vpack.c.bf16 %v2095_v41, %v1045_v40 }
 0x4a5   : > { %v2098_v48 = vpop.f32.mrb[36].mxu0  ;;  %2405 = vmatprep.subr.bf16.mxu1 %v2404_v47 }
 0x4a6   : > { %v1055_v49 = vpop.f32.mrb[37].mxu0  ;;  %2407 = vmatpush3.bf16.msra.mxu1 %v2404_v47 }
 0x4a7   : > { %v2408_v50 = vpack.c.bf16 %v2098_v48, %v1055_v49 }
 0x4a9   : > { %v2101_v43 = vpop.f32.mrb[38].mxu0  ;;  %2409 = vmatprep.subr.bf16.mxu1 %v2408_v50 }
 0x4aa   : > { %v1065_v51 = vpop.f32.mrb[39].mxu0  ;;  %2411 = vmatpush3.bf16.msra.mxu1 %v2408_v50 }
 0x4ab   : > { %v2412_v52 = vpack.c.bf16 %v2101_v43, %v1065_v51 }
 0x4ad   : > { %v2104_v53 = vpop.f32.mrb[40].mxu0  ;;  %2413 = vmatprep.subr.bf16.mxu1 %v2412_v52 }
 0x4ae   : > { %v1075_v54 = vpop.f32.mrb[41].mxu0  ;;  %2415 = vmatpush3.bf16.msra.mxu1 %v2412_v52 }
 0x4af   : > { %v2416_v55 = vpack.c.bf16 %v2104_v53, %v1075_v54 }
 0x4b1   : > { %v2107_v56 = vpop.f32.mrb[42].mxu0  ;;  %2417 = vmatprep.subr.bf16.mxu1 %v2416_v55 }
 0x4b2   : > { %v1085_v57 = vpop.f32.mrb[43].mxu0  ;;  %2419 = vmatpush3.bf16.msra.mxu1 %v2416_v55 }
 0x4b3   : > { %v2420_v58 = vpack.c.bf16 %v2107_v56, %v1085_v57 }
 0x4b5   : > { %v2110_v59 = vpop.f32.mrb[44].mxu0  ;;  %2421 = vmatprep.subr.bf16.mxu1 %v2420_v58 }
 0x4b6   : > { %v1095_v60 = vpop.f32.mrb[45].mxu0  ;;  %2423 = vmatpush3.bf16.msra.mxu1 %v2420_v58 }
 0x4b7   : > { %v2424_v61 = vpack.c.bf16 %v2110_v59, %v1095_v60 }
 0x4b9   : > { %v2113_v62 = vpop.f32.mrb[46].mxu0  ;;  %2425 = vmatprep.subr.bf16.mxu1 %v2424_v61 }
 0x4ba   : > { %v1105_v63 = vpop.f32.mrb[47].mxu0  ;;  %2427 = vmatpush3.bf16.msra.mxu1 %v2424_v61 }
 0x4bb   : > { %v2428_v0 = vpack.c.bf16 %v2113_v62, %v1105_v63 }
 0x4bd   : > { %2429 = vmatprep.subr.bf16.mxu1 %v2428_v0 }
 0x4be   : > { %2431 = vmatpush3.bf16.msra.mxu1 %v2428_v0 }
 0x4c1   : > { %2147 = vmatmul.mubr.f32.vlgmr.msra.gmra.mrb[32].mxu1 %v2678_v22  ;;  %v1280_v22 = vld [vmem:[%s2835_s16] sm:$0xff] }
 0x4c2   : > { %2149 = vmatprep.mubr.f32.mxu1 %v2681_v23  ;;  %2202 = vmatprep.mubr.f32.mxu0 %v1280_v22  ;;  %v1583_v23 = vld [vmem:[%s2922_s3 + $0x180] sm:$0xff] }
 0x4c5   : > { %2150 = vmatmul.mubr.f32.gmra.mrb[34].mxu1 %v2686_v24  ;;  %v1584_v24 = vld [vmem:[%s2922_s3 + $0x188] sm:$0xff] }
 0x4c6   : > { %2152 = vmatprep.mubr.f32.mxu1 %v2689_v25  ;;  %v1585_v25 = vld [vmem:[%s2922_s3 + $0x190] sm:$0xff] }
 0x4c9   : > { %2153 = vmatmul.mubr.f32.gmra.mrb[36].mxu1 %v2694_v26  ;;  %v2464_v26 = vpack.c.bf16 %v1584_v24, %v1583_v23 }
 0x4ca   : > { %2155 = vmatprep.mubr.f32.mxu1 %v2697_v27  ;;  %v1586_v27 = vld [vmem:[%s2922_s3 + $0x198] sm:$0xff] }
 0x4cb   : > { %2465 = vmatprep.subr.bf16.mxu1 %v2464_v26 }
 0x4cc   : > { %2467 = vmatpush3.bf16.msra.mxu1 %v2464_v26 }
 0x4cd   : > { %2156 = vmatmul.mubr.f32.gmra.mrb[38].mxu1 %v2702_v28  ;;  %v2468_v28 = vpack.c.bf16 %v1586_v27, %v1585_v25 }
 0x4ce   : > { %2158 = vmatprep.mubr.f32.mxu1 %v2705_v29  ;;  %v1587_v29 = vld [vmem:[%s2922_s3 + $0x1a0] sm:$0xff] }
 0x4cf   : > { %2469 = vmatprep.subr.bf16.mxu1 %v2468_v28 }
 0x4d0   : > { %2471 = vmatpush3.bf16.msra.mxu1 %v2468_v28 }
 0x4d1   : > { %2159 = vmatmul.mubr.f32.gmra.mrb[40].mxu1 %v2710_v30  ;;  %v1588_v30 = vld [vmem:[%s2922_s3 + $0x1a8] sm:$0xff] }
 0x4d2   : > { %2161 = vmatprep.mubr.f32.mxu1 %v2713_v31  ;;  %v2472_v31 = vpack.c.bf16 %v1588_v30, %v1587_v29 }
 0x4d4   : > { %2473 = vmatprep.subr.bf16.mxu1 %v2472_v31 }
 0x4d5   : > { %2162 = vmatmul.mubr.f32.gmra.mrb[42].mxu1 %v2718_v32  ;;  %v1589_v32 = vld [vmem:[%s2922_s3 + $0x1b0] sm:$0xff] }
 0x4d6   : > { %2164 = vmatprep.mubr.f32.mxu1 %v2721_v33  ;;  %v1590_v33 = vld [vmem:[%s2922_s3 + $0x1b8] sm:$0xff]  ;;  %2475 = vmatpush3.bf16.msra.mxu1 %v2472_v31 }
 0x4d9   : > { %2165 = vmatmul.mubr.f32.gmra.mrb[44].mxu1 %v2726_v34  ;;  %v2476_v34 = vpack.c.bf16 %v1590_v33, %v1589_v32 }
 0x4da   : > { %2167 = vmatprep.mubr.f32.mxu1 %v2729_v35  ;;  %v1591_v35 = vld [vmem:[%s2922_s3 + $0x1c0] sm:$0xff] }
 0x4db   : > { %2477 = vmatprep.subr.bf16.mxu1 %v2476_v34 }
 0x4dc   : > { %2479 = vmatpush3.bf16.msra.mxu1 %v2476_v34 }
 0x4dd   : > { %2168 = vmatmul.mubr.f32.gmra.mrb[46].mxu1 %v2734_v36  ;;  %v1592_v36 = vld [vmem:[%s2922_s3 + $0x1c8] sm:$0xff] }
 0x4de   : > { %v2480_v1 = vpack.c.bf16 %v1592_v36, %v1591_v35 }
 0x4e0   : > { %2481 = vmatprep.subr.bf16.mxu1 %v2480_v1 }
 0x4e1   : > { %2483 = vmatpush3.bf16.msra.mxu1 %v2480_v1 }
 0x4e2   : > { %2485 = vmatprep.subr.bf16.mxu1 %v2484_v4 }
 0x4e5   : > { %2487 = vmatpush3.bf16.msra.mxu1 %v2484_v4  ;;  %v1281_v4 = vld [vmem:[%s2835_s16 + $0x8] sm:$0xff] }
 0x4e6   : > { %2489 = vmatprep.subr.bf16.mxu1 %v2488_v7 }
 0x4e9   : > { %2491 = vmatpush3.bf16.msra.mxu1 %v2488_v7  ;;  %v1599_v7 = vld [vmem:[%s2923_s4 + $0x3] ss:$0 sm:$0xff] }
 0x4ea   : > { %2493 = vmatprep.subr.bf16.mxu1 %v2492_v10 }
 0x4ed   : > { %2495 = vmatpush3.bf16.msra.mxu1 %v2492_v10 }
 0x594   : > { %v2148_v12 = vpop.f32.mrb[32].mxu1 }
 0x595   : > { %v1191_v13 = vadd.f32 %v2148_v12, %v2889_v11  ;;  %v1185_v14 = vpop.f32.mrb[33].mxu1 }
 0x596   : > { %v1186_v15 = vadd.f32 %v2889_v11, %v1185_v14 }
 0x597   : > { %v1265_v16 = vmax.f32 %v1191_v13, 0.0 }
 0x598   : > { %v1264_v17 = vmax.f32 %v1186_v15, 0.0  ;;  %v2151_v18 = vpop.f32.mrb[34].mxu1 }
 0x599   : > { %v1201_v19 = vadd.f32 %v2151_v18, %v2889_v11  ;;  %v1195_v20 = vpop.f32.mrb[35].mxu1 }
 0x59a   : > { %v2432_v21 = vpack.c.bf16 %v1265_v16, %v1264_v17  ;;  %v1196_v37 = vadd.f32 %v2889_v11, %v1195_v20 }
 0x59b   : > { %v1267_v38 = vmax.f32 %v1201_v19, 0.0 }
 0x59c   : > { %v1266_v39 = vmax.f32 %v1196_v37, 0.0  ;;  %v2154_v42 = vpop.f32.mrb[36].mxu1  ;;  %2433 = vmatprep.subr.bf16.mxu0 %v2432_v21 }
 0x59d   : > { %v1211_v44 = vadd.f32 %v2154_v42, %v2889_v11  ;;  %v1205_v45 = vpop.f32.mrb[37].mxu1  ;;  %2435 = vmatpush3.bf16.msra.mxu0 %v2432_v21 }
 0x59e   : > { %v2436_v46 = vpack.c.bf16 %v1267_v38, %v1266_v39  ;;  %v1206_v41 = vadd.f32 %v2889_v11, %v1205_v45 }
 0x59f   : > { %v1269_v40 = vmax.f32 %v1211_v44, 0.0 }
 0x5a0   : > { %v1268_v47 = vmax.f32 %v1206_v41, 0.0  ;;  %v2157_v48 = vpop.f32.mrb[38].mxu1  ;;  %2437 = vmatprep.subr.bf16.mxu0 %v2436_v46 }
 0x5a1   : > { %v1221_v49 = vadd.f32 %v2157_v48, %v2889_v11  ;;  %v1215_v50 = vpop.f32.mrb[39].mxu1  ;;  %2439 = vmatpush3.bf16.msra.mxu0 %v2436_v46 }
 0x5a2   : > { %v2440_v43 = vpack.c.bf16 %v1269_v40, %v1268_v47  ;;  %v1216_v51 = vadd.f32 %v2889_v11, %v1215_v50 }
 0x5a3   : > { %v1271_v52 = vmax.f32 %v1221_v49, 0.0 }
 0x5a4   : > { %v1270_v53 = vmax.f32 %v1216_v51, 0.0  ;;  %v2160_v54 = vpop.f32.mrb[40].mxu1  ;;  %2441 = vmatprep.subr.bf16.mxu0 %v2440_v43 }
 0x5a5   : > { %v1231_v55 = vadd.f32 %v2160_v54, %v2889_v11  ;;  %v1225_v56 = vpop.f32.mrb[41].mxu1  ;;  %2443 = vmatpush3.bf16.msra.mxu0 %v2440_v43 }
 0x5a6   : > { %v2444_v57 = vpack.c.bf16 %v1271_v52, %v1270_v53  ;;  %v1226_v58 = vadd.f32 %v2889_v11, %v1225_v56 }
 0x5a7   : > { %v1273_v59 = vmax.f32 %v1231_v55, 0.0 }
 0x5a8   : > { %v1272_v60 = vmax.f32 %v1226_v58, 0.0  ;;  %v2163_v61 = vpop.f32.mrb[42].mxu1  ;;  %2445 = vmatprep.subr.bf16.mxu0 %v2444_v57 }
 0x5a9   : > { %v1241_v62 = vadd.f32 %v2163_v61, %v2889_v11  ;;  %v1235_v63 = vpop.f32.mrb[43].mxu1  ;;  %2447 = vmatpush3.bf16.msra.mxu0 %v2444_v57 }
 0x5aa   : > { %v2448_v0 = vpack.c.bf16 %v1273_v59, %v1272_v60  ;;  %v1236_v22 = vadd.f32 %v2889_v11, %v1235_v63 }
 0x5ab   : > { %v1275_v23 = vmax.f32 %v1241_v62, 0.0 }
 0x5ac   : > { %v1274_v24 = vmax.f32 %v1236_v22, 0.0  ;;  %v2166_v25 = vpop.f32.mrb[44].mxu1  ;;  %2449 = vmatprep.subr.bf16.mxu0 %v2448_v0 }
 0x5ad   : > { %v1251_v26 = vadd.f32 %v2166_v25, %v2889_v11  ;;  %v1245_v27 = vpop.f32.mrb[45].mxu1  ;;  %2451 = vmatpush3.bf16.msra.mxu0 %v2448_v0 }
 0x5ae   : > { %v2452_v28 = vpack.c.bf16 %v1275_v23, %v1274_v24  ;;  %v1246_v29 = vadd.f32 %v2889_v11, %v1245_v27 }
 0x5af   : > { %v1277_v30 = vmax.f32 %v1251_v26, 0.0 }
 0x5b0   : > { %v1276_v31 = vmax.f32 %v1246_v29, 0.0  ;;  %v2169_v32 = vpop.f32.mrb[46].mxu1  ;;  %2453 = vmatprep.subr.bf16.mxu0 %v2452_v28 }
 0x5b1   : > { %v1261_v33 = vadd.f32 %v2169_v32, %v2889_v11  ;;  %v1255_v34 = vpop.f32.mrb[47].mxu1  ;;  %2455 = vmatpush3.bf16.msra.mxu0 %v2452_v28 }
 0x5b2   : > { %v2456_v35 = vpack.c.bf16 %v1277_v30, %v1276_v31  ;;  %v1256_v36 = vadd.f32 %v2889_v11, %v1255_v34 }
 0x5b3   : > { %v1279_v1 = vmax.f32 %v1261_v33, 0.0 }
 0x5b4   : > { %v1278_v2 = vmax.f32 %v1256_v36, 0.0  ;;  %2457 = vmatprep.subr.bf16.mxu0 %v2456_v35 }
 0x5b5   : > { %2459 = vmatpush3.bf16.msra.mxu0 %v2456_v35 }
 0x5b6   : > { %v2460_v3 = vpack.c.bf16 %v1279_v1, %v1278_v2 }
 0x5b8   : > { %2461 = vmatprep.subr.bf16.mxu0 %v2460_v3 }
 0x5b9   : > { %2463 = vmatpush3.bf16.msra.mxu0 %v2460_v3 }
 0x5bc   : > { %2203 = vmatmul.mubr.f32.vlgmr.msra.gmra.mrb[48].mxu0 %v1281_v4 }
 0x68f   : > { %v2204_v5 = vpop.f32.mrb[48].mxu0 }
 0x690   : > { %v1348_v6 = vpop.f32.mrb[49].mxu0 }
 0x691   : > { %2237 = vmatprep.mubr.f32.mxu1 %v1348_v6 }
 0x692   : > { %2238 = vmatmul.mubr.f32.vlgmr.msra.gmra.mrb[48].mxu1 %v2204_v5 }
 0x765   : > { %v2239_v8 = vpop.f32.mrb[48].mxu1 }
 0x766   : > { %v1451_v9 = vadd.f32 %v2239_v8, %v1599_v7  ;;  %v1445_v10 = vpop.f32.mrb[49].mxu1 }
 0x767   : > { %v1446_v11 = vadd.f32 %v1599_v7, %v1445_v10 }
 0x768   : > { %1455 = vst [vmem:[%s264_s9 + $0x8] sm:$0xff] %v1451_v9 }
 0x769   : > { %1454 = vst [vmem:[%s264_s9] sm:$0xff] %v1446_v11 }
 0x76a PF: > { %s15_s18 = sadd.s32 1, %s2510_s18  }
 0x76b   : > { %p12_p4 = scmp.ge.s32.totalorder %s15_s18, 4  }
 0x76d   :  { %14 = sbr.rel (!%p12_p4) target bundleno = 1 (0x1), region = 79 }

</bundles_post_ra>
